<compile_context>
chip_gen: v6e
topology: v6e:2x2x1
jax: 0.10.0
libtpu: 0.0.40
codegen_flags: <defaults>
</compile_context>

<pallas_src>
import functools

import jax
import jax.numpy as jnp
from jax.experimental import pallas as pl
from jax.experimental.pallas import tpu as pltpu

_NEG_FILL = -1e30


def _gat_kernel(x_ref, w2_ref, a2_ref, bias_ref, b_ref, out_ref, *,
                graphs_per_block, n_nodes, heads, c_per_head, neg_slope):
    gb, n, H, C = graphs_per_block, n_nodes, heads, c_per_head

    # F.relu on raw node features, then one lane-dense MXU matmul for the
    # whole block of graphs (heads folded into the lane axis).
    x = jnp.maximum(x_ref[...], 0.0)                                        # [Gb*N, D]
    xw2 = jnp.dot(x, w2_ref[...], preferred_element_type=jnp.float32)       # [Gb*N, HC]

    # fused attention-logit pieces: a single tiny MXU dot -> [Gb*N, 2H]
    a = jnp.dot(xw2, a2_ref[...], preferred_element_type=jnp.float32)       # [Gb*N, 2H]
    a = a.reshape(gb, n, 2 * H)
    a_src = jnp.transpose(a[..., :H], (0, 2, 1))                            # [Gb, H, N] (source j)
    a_dst = jnp.transpose(a[..., H:], (0, 2, 1))                            # [Gb, H, N] (dest   i)

    # bias_ref already holds (edge_attr @ W_edge) . att_edge where an edge or
    # self-loop exists and -1e30 elsewhere -> no separate mask / where needed.
    logits = a_dst[..., :, None] + a_src[..., None, :] + bias_ref[...]      # [Gb, H, i, j]
    logits = jnp.where(logits > 0, logits, neg_slope * logits)              # leaky_relu(0.2)

    # softmax over incoming edges j (last / lane axis), per destination i,
    # per head, vectorized over the graph dim.  Exact reciprocal (division)
    # keeps the result well inside the f32 reference tolerance.
    m = jnp.max(logits, axis=-1, keepdims=True)
    p = jnp.exp(logits - m)                                                 # masked -> 0
    denom = jnp.sum(p, axis=-1, keepdims=True)
    alpha = p / denom                                                       # [Gb, H, i, j]
    # NOTE: GATConv attention dropout is identity in eval mode -> skipped.

    # per (graph, head) aggregation: small 2-D MXU matmuls written straight
    # into static slices of the output (no concat temporary), bias fused in.
    b = b_ref[...]                                                          # [1, HC]
    for g in range(gb):
        xw_g = xw2[g * n:(g + 1) * n, :]                                    # [N, HC]
        for h in range(H):
            agg = jnp.dot(alpha[g, h], xw_g[:, h * C:(h + 1) * C],
                          preferred_element_type=jnp.float32)               # [N, C]
            out_ref[g * n:(g + 1) * n, h * C:(h + 1) * C] = (
                agg + b[:, h * C:(h + 1) * C])


def _edge_mask_bias(edge_index, edge_attr, v_edge, n_nodes):
    """Fused additive attention bias [H, N_i, N_j]:
       (edge_attr @ W_edge) . att_edge where an edge / self-loop exists,
       -1e30 elsewhere.  Built with one-hot matmuls (no scatters), so it is
       vmap-friendly and avoids serialized TPU scatter ops.
       Assumes no duplicate (src, dst) parallel edges."""
    N = n_nodes
    src, dst = edge_index[0], edge_index[1]
    nonself = (src != dst).astype(jnp.float32)                              # [E]
    oh_src = jax.nn.one_hot(src, N, dtype=jnp.float32)                      # [E, N]
    oh_dst = jax.nn.one_hot(dst, N, dtype=jnp.float32) * nonself[:, None]   # self edges removed

    # 'mean' fill value for added self loops: mean of incoming non-self edge_attr
    deg = jnp.sum(oh_dst, axis=0)                                           # [N]
    attr_sum = oh_dst.T @ edge_attr                                         # [N, De]
    loop_attr = jnp.where(deg[:, None] > 0,
                          attr_sum / jnp.maximum(deg, 1.0)[:, None], 0.0)

    e_bias = edge_attr @ v_edge                                             # [E, H]
    loop_bias = loop_attr @ v_edge                                          # [N, H]

    # dense [dst, src, H] bias + adjacency via one-hot contractions
    bias_sum = jnp.einsum('ei,ej,eh->ijh', oh_dst, oh_src, e_bias)          # [N, N, H]
    adj = jnp.einsum('ei,ej->ij', oh_dst, oh_src)                           # [N, N]
    eye = jnp.eye(N, dtype=jnp.float32)
    adj = adj + eye                                                         # added self loops
    bias_sum = bias_sum + eye[:, :, None] * loop_bias[:, None, :]
    bias = jnp.where(adj[:, :, None] > 0, bias_sum, _NEG_FILL)
    return jnp.transpose(bias, (2, 0, 1))                                   # [H, dst, src]


def intra_graph_attention_batched(x_b, edge_index_b, edge_attr_b, params, *,
                                  neg_slope=0.2, graphs_per_block=None):
    G, N, D = x_b.shape
    W, att_src, att_dst = params['W'], params['att_src'], params['att_dst']
    W_edge, att_edge, bias = params['W_edge'], params['att_edge'], params['bias']
    H, C = att_src.shape
    HC = H * C

    if graphs_per_block is None:
        # batch graphs per grid step, but keep >=2 grid iterations so
        # ("parallel",) can still shard across both TensorCores on v7x.
        graphs_per_block = G // 2 if (G >= 2 and G % 2 == 0) else 1
    assert G % graphs_per_block == 0
    Gb = graphs_per_block
    n_blocks = G // Gb

    # ---- parameter-only precomputation (hoisted out of the kernel) ----
    W2 = W.reshape(D, HC).astype(jnp.float32)                  # heads -> lane axis
    v_edge = jnp.einsum('dhc,hc->dh', W_edge, att_edge)        # [De, H]
    rows = jnp.arange(HC)
    head_idx = rows // C
    A2 = jnp.zeros((HC, 2 * H), jnp.float32)                   # fused [src | dst] logit matrix
    A2 = A2.at[rows, head_idx].set(att_src.reshape(-1))
    A2 = A2.at[rows, H + head_idx].set(att_dst.reshape(-1))
    b2d = bias.reshape(1, HC).astype(jnp.float32)

    # ---- per-graph fused edge-bias + mask tensor (scatter-free JAX glue) ----
    bias_b = jax.vmap(lambda ei, ea: _edge_mask_bias(ei, ea, v_edge, N))(
        edge_index_b, edge_attr_b)                             # [G, H, N, N]

    x_flat = x_b.reshape(G * N, D)

    kernel = functools.partial(_gat_kernel, graphs_per_block=Gb, n_nodes=N,
                               heads=H, c_per_head=C, neg_slope=neg_slope)
    out = pl.pallas_call(
        kernel,
        out_shape=jax.ShapeDtypeStruct((G * N, HC), jnp.float32),
        grid=(n_blocks,),
        in_specs=[
            pl.BlockSpec((Gb * N, D), lambda t: (t, 0)),            # node feats, Gb graphs
            pl.BlockSpec((D, HC), lambda t: (0, 0)),                # W2 (shared)
            pl.BlockSpec((HC, 2 * H), lambda t: (0, 0)),            # fused A_src|A_dst
            pl.BlockSpec((Gb, H, N, N), lambda t: (t, 0, 0, 0)),    # fused edge bias + mask
            pl.BlockSpec((1, HC), lambda t: (0, 0)),                # output bias
        ],
        out_specs=pl.BlockSpec((Gb * N, HC), lambda t: (t, 0)),
        compiler_params=pltpu.CompilerParams(dimension_semantics=("parallel",)),
    )(x_flat, W2, A2, bias_b, b2d)
    return out.reshape(G, N, HC)                                # [G, N, H*C]


def intra_graph_attention(x, edge_index, edge_attr, params, *, neg_slope=0.2):
    """Single-graph API matching IntraGraphAttention.forward (eval mode)."""
    out = intra_graph_attention_batched(x[None], edge_index[None], edge_attr[None],
                                        params, neg_slope=neg_slope)
    return out[0]                                               # [N, H*C]


def _reference_single(x, edge_index, edge_attr, params, *, neg_slope=0.2):
    """Pure-JAX reference mirroring GATConv on the densified graph (vmap-friendly)."""
    N, _ = x.shape
    W, att_src, att_dst = params['W'], params['att_src'], params['att_dst']
    W_edge, att_edge, bias = params['W_edge'], params['att_edge'], params['bias']
    H, C = att_src.shape
    De = W_edge.shape[0]

    src, dst = edge_index[0], edge_index[1]
    nonself = src != dst
    w = nonself.astype(jnp.float32)
    deg = jnp.zeros((N,), jnp.float32).at[dst].add(w)
    attr_sum = jnp.zeros((N, De), jnp.float32).at[dst].add(edge_attr * w[:, None])
    loop_attr = jnp.where(deg[:, None] > 0,
                          attr_sum / jnp.maximum(deg, 1.0)[:, None], 0.0)
    diag = jnp.arange(N)
    dst_s = jnp.where(nonself, dst, N)
    ea_dense = jnp.zeros((N + 1, N, De), jnp.float32).at[dst_s, src].set(edge_attr)[:N]
    ea_dense = ea_dense.at[diag, diag].set(loop_attr)
    mask = jnp.zeros((N + 1, N), jnp.float32).at[dst_s, src].set(1.0)[:N]
    mask = mask.at[diag, diag].set(1.0)

    xr = jnp.maximum(x, 0.0)
    xw = jnp.einsum('nd,dhc->nhc', xr, W)
    a_src = jnp.einsum('nhc,hc->nh', xw, att_src)
    a_dst = jnp.einsum('nhc,hc->nh', xw, att_dst)
    ew = jnp.einsum('ijd,dhc->ijhc', ea_dense, W_edge)
    a_edge = jnp.einsum('ijhc,hc->ijh', ew, att_edge)
    logits = a_dst[:, None, :] + a_src[None, :, :] + a_edge
    logits = jnp.where(logits > 0, logits, neg_slope * logits)
    m3 = mask[:, :, None] > 0
    logits = jnp.where(m3, logits, -jnp.inf)
    alpha = jax.nn.softmax(logits, axis=1)
    alpha = jnp.where(m3, alpha, 0.0)
    out = jnp.einsum('ijh,jhc->ihc', alpha, xw) + bias[None, :, :]
    return out.reshape(N, H * C)


if __name__ == "__main__":
    # IntraGraphAttention(input_dim=32, dp=0.2, head=2, edge=6, head_out_feats=16)
    G, N, input_dim, head, head_out_feats, edge_dim = 4, 8, 32, 2, 16, 6
    dp = 0.2  # dropout on attention coeffs -> identity in eval mode
    C = head_out_feats // 2  # GATConv out_channels per head

    key = jax.random.PRNGKey(0)
    k = jax.random.split(key, 8)

    x_b = jax.random.normal(k[0], (G, N, input_dim), jnp.float32)

    # per-graph ring-style edge lists: no self loops, no duplicate (src, dst)
    base = jnp.arange(N)
    edge_index_list = []
    for g in range(G):
        src = jnp.concatenate([base, base])
        dst = jnp.concatenate([(base + 1 + g) % N, (base + 5) % N])
        edge_index_list.append(jnp.stack([src, dst]).astype(jnp.int32))
    edge_index_b = jnp.stack(edge_index_list)                  # [G, 2, E]
    E = edge_index_b.shape[-1]
    edge_attr_b = jax.random.normal(k[1], (G, E, edge_dim), jnp.float32)

    s = 0.1  # deterministic synthetic init (not a checkpoint load)
    params = dict(
        W=s * jax.random.normal(k[2], (input_dim, head, C), jnp.float32),
        att_src=s * jax.random.normal(k[3], (head, C), jnp.float32),
        att_dst=s * jax.random.normal(k[4], (head, C), jnp.float32),
        W_edge=s * jax.random.normal(k[5], (edge_dim, head, C), jnp.float32),
        att_edge=s * jax.random.normal(k[6], (head, C), jnp.float32),
        bias=(s * jax.random.normal(k[7], (head * C,), jnp.float32)).reshape(head, C),
    )

    out = intra_graph_attention_batched(x_b, edge_index_b, edge_attr_b, params)
    out = jax.block_until_ready(out)
    assert out.shape == (G, N, head * C), out.shape

    ref = jax.vmap(lambda x, ei, ea: _reference_single(x, ei, ea, params))(
        x_b, edge_index_b, edge_attr_b)
    err = float(jnp.max(jnp.abs(out - ref)))
    assert jnp.allclose(out, ref, atol=1e-3, rtol=1e-3), err

    # module-equivalent single-graph path
    out1 = intra_graph_attention(x_b[0], edge_index_b[0], edge_attr_b[0], params)
    out1 = jax.block_until_ready(out1)
    assert out1.shape == (N, head * C)
    assert jnp.allclose(out1, ref[0], atol=1e-3, rtol=1e-3)

    print("KERNEL_OK")
</pallas_src>

<mosaic_0001>
module attributes {stable_mosaic.version = 11 : i64} {
  func.func @_gat_kernel(%arg0: i32, %arg1: memref<16x32xf32, #tpu.memory_space<vmem>>, %arg2: memref<32x16xf32, #tpu.memory_space<vmem>>, %arg3: memref<16x4xf32, #tpu.memory_space<vmem>>, %arg4: memref<2x2x8x8xf32, #tpu.memory_space<vmem>>, %arg5: memref<1x16xf32, #tpu.memory_space<vmem>>, %arg6: memref<16x16xf32, #tpu.memory_space<vmem>>) attributes {dimension_semantics = [#tpu.dimension_semantics<parallel>], iteration_bounds = array<i64: 2>, scalar_prefetch = 0 : i64, scratch_operands = 0 : i64, tpu.core_type = #tpu.core_type<tc>, window_params = [{transform_indices = @transform_0, window_bounds = array<i64: 16, 32>}, {pipeline_mode = #tpu.pipeline_mode<synchronous>, transform_indices = @transform_1, window_bounds = array<i64: 32, 16>}, {pipeline_mode = #tpu.pipeline_mode<synchronous>, transform_indices = @transform_2, window_bounds = array<i64: 16, 4>}, {transform_indices = @transform_3, window_bounds = array<i64: 2, 2, 8, 8>}, {pipeline_mode = #tpu.pipeline_mode<synchronous>, transform_indices = @transform_4, window_bounds = array<i64: 1, 16>}, {transform_indices = @transform_5, window_bounds = array<i64: 16, 16>}]} {
    %c0 = arith.constant 0 : index
    %c0_0 = arith.constant 0 : index
    %0 = vector.load %arg1[%c0, %c0_0] : memref<16x32xf32, #tpu.memory_space<vmem>>, vector<16x32xf32>
    %cst = arith.constant 0.000000e+00 : f32
    %1 = vector.broadcast %cst : f32 to vector<16x32xf32>
    %2 = arith.maximumf %0, %1 : vector<16x32xf32>
    %c0_1 = arith.constant 0 : index
    %c0_2 = arith.constant 0 : index
    %3 = vector.load %arg2[%c0_1, %c0_2] : memref<32x16xf32, #tpu.memory_space<vmem>>, vector<32x16xf32>
    %cst_3 = arith.constant dense<0.000000e+00> : vector<16x16xf32>
    %4 = tpu.matmul %2, %3, %cst_3 {dimension_numbers = #tpu.dot_dimension_numbers<[1], [0], [0], [1], [0, 0, 1, 1], [], []>} : vector<16x32xf32>, vector<32x16xf32>, vector<16x16xf32> -> vector<16x16xf32>
    %c0_4 = arith.constant 0 : index
    %c0_5 = arith.constant 0 : index
    %5 = vector.load %arg3[%c0_4, %c0_5] : memref<16x4xf32, #tpu.memory_space<vmem>>, vector<16x4xf32>
    %cst_6 = arith.constant dense<0.000000e+00> : vector<16x4xf32>
    %6 = tpu.matmul %4, %5, %cst_6 {dimension_numbers = #tpu.dot_dimension_numbers<[1], [0], [0], [1], [0, 0, 1, 1], [], []>} : vector<16x16xf32>, vector<16x4xf32>, vector<16x4xf32> -> vector<16x4xf32>
    %7 = vector.shape_cast %6 : vector<16x4xf32> to vector<2x8x4xf32>
    %8 = vector.extract_strided_slice %7 {offsets = [0, 0, 0], sizes = [2, 8, 2], strides = [1, 1, 1]} : vector<2x8x4xf32> to vector<2x8x2xf32>
    %9 = tpu.transpose %8, [0, 2, 1] : vector<2x8x2xf32> -> vector<2x2x8xf32>
    %10 = vector.extract_strided_slice %7 {offsets = [0, 0, 2], sizes = [2, 8, 2], strides = [1, 1, 1]} : vector<2x8x4xf32> to vector<2x8x2xf32>
    %11 = tpu.transpose %10, [0, 2, 1] : vector<2x8x2xf32> -> vector<2x2x8xf32>
    %12 = vector.shape_cast %11 : vector<2x2x8xf32> to vector<2x2x8x1xf32>
    %13 = vector.shape_cast %9 : vector<2x2x8xf32> to vector<2x2x1x8xf32>
    %14 = vector.broadcast %12 : vector<2x2x8x1xf32> to vector<2x2x8x8xf32>
    %15 = vector.broadcast %13 : vector<2x2x1x8xf32> to vector<2x2x8x8xf32>
    %16 = arith.addf %14, %15 : vector<2x2x8x8xf32>
    %c0_7 = arith.constant 0 : index
    %c0_8 = arith.constant 0 : index
    %c0_9 = arith.constant 0 : index
    %c0_10 = arith.constant 0 : index
    %17 = vector.load %arg4[%c0_7, %c0_8, %c0_9, %c0_10] : memref<2x2x8x8xf32, #tpu.memory_space<vmem>>, vector<2x2x8x8xf32>
    %18 = arith.addf %16, %17 : vector<2x2x8x8xf32>
    %cst_11 = arith.constant 0.000000e+00 : f32
    %19 = vector.broadcast %cst_11 : f32 to vector<2x2x8x8xf32>
    %20 = arith.cmpf ogt, %18, %19 : vector<2x2x8x8xf32>
    %cst_12 = arith.constant 2.000000e-01 : f32
    %21 = vector.broadcast %cst_12 : f32 to vector<2x2x8x8xf32>
    %22 = arith.mulf %21, %18 : vector<2x2x8x8xf32>
    %23 = arith.select %20, %18, %22 : vector<2x2x8x8xi1>, vector<2x2x8x8xf32>
    %cst_13 = arith.constant dense<0xFF800000> : vector<2x2x8xf32>
    %24 = vector.multi_reduction <maximumf>, %23, %cst_13 [3] : vector<2x2x8x8xf32> to vector<2x2x8xf32>
    %25 = vector.shape_cast %24 : vector<2x2x8xf32> to vector<2x2x8x1xf32>
    %26 = vector.broadcast %25 : vector<2x2x8x1xf32> to vector<2x2x8x8xf32>
    %27 = arith.subf %23, %26 : vector<2x2x8x8xf32>
    %28 = math.exp %27 : vector<2x2x8x8xf32>
    %cst_14 = arith.constant dense<0.000000e+00> : vector<2x2x8xf32>
    %29 = vector.multi_reduction <add>, %28, %cst_14 [3] : vector<2x2x8x8xf32> to vector<2x2x8xf32>
    %30 = vector.shape_cast %29 : vector<2x2x8xf32> to vector<2x2x8x1xf32>
    %31 = vector.broadcast %30 : vector<2x2x8x1xf32> to vector<2x2x8x8xf32>
    %32 = arith.divf %28, %31 : vector<2x2x8x8xf32>
    %c0_15 = arith.constant 0 : index
    %c0_16 = arith.constant 0 : index
    %33 = vector.load %arg5[%c0_15, %c0_16] : memref<1x16xf32, #tpu.memory_space<vmem>>, vector<1x16xf32>
    %34 = vector.extract_strided_slice %4 {offsets = [0, 0], sizes = [8, 16], strides = [1, 1]} : vector<16x16xf32> to vector<8x16xf32>
    %35 = vector.extract_strided_slice %32 {offsets = [0, 0, 0, 0], sizes = [1, 1, 8, 8], strides = [1, 1, 1, 1]} : vector<2x2x8x8xf32> to vector<1x1x8x8xf32>
    %36 = vector.shape_cast %35 : vector<1x1x8x8xf32> to vector<8x8xf32>
    %37 = vector.extract_strided_slice %34 {offsets = [0, 0], sizes = [8, 8], strides = [1, 1]} : vector<8x16xf32> to vector<8x8xf32>
    %cst_17 = arith.constant dense<0.000000e+00> : vector<8x8xf32>
    %38 = tpu.matmul %36, %37, %cst_17 {dimension_numbers = #tpu.dot_dimension_numbers<[1], [0], [0], [1], [0, 0, 1, 1], [], []>} : vector<8x8xf32>, vector<8x8xf32>, vector<8x8xf32> -> vector<8x8xf32>
    %39 = vector.extract_strided_slice %33 {offsets = [0, 0], sizes = [1, 8], strides = [1, 1]} : vector<1x16xf32> to vector<1x8xf32>
    %40 = vector.broadcast %39 : vector<1x8xf32> to vector<8x8xf32>
    %41 = arith.addf %38, %40 : vector<8x8xf32>
    %c0_18 = arith.constant 0 : index
    %c0_19 = arith.constant 0 : index
    %42 = vector.load %arg6[%c0_18, %c0_19] : memref<16x16xf32, #tpu.memory_space<vmem>>, vector<8x8xf32>
    tpu.vector_store %arg6[%c0_18, %c0_19], %41 {strides = array<i32>} : memref<16x16xf32, #tpu.memory_space<vmem>>, vector<8x8xf32>,
    %43 = vector.extract_strided_slice %32 {offsets = [0, 1, 0, 0], sizes = [1, 1, 8, 8], strides = [1, 1, 1, 1]} : vector<2x2x8x8xf32> to vector<1x1x8x8xf32>
    %44 = vector.shape_cast %43 : vector<1x1x8x8xf32> to vector<8x8xf32>
    %45 = vector.extract_strided_slice %34 {offsets = [0, 8], sizes = [8, 8], strides = [1, 1]} : vector<8x16xf32> to vector<8x8xf32>
    %cst_20 = arith.constant dense<0.000000e+00> : vector<8x8xf32>
    %46 = tpu.matmul %44, %45, %cst_20 {dimension_numbers = #tpu.dot_dimension_numbers<[1], [0], [0], [1], [0, 0, 1, 1], [], []>} : vector<8x8xf32>, vector<8x8xf32>, vector<8x8xf32> -> vector<8x8xf32>
    %47 = vector.extract_strided_slice %33 {offsets = [0, 8], sizes = [1, 8], strides = [1, 1]} : vector<1x16xf32> to vector<1x8xf32>
    %48 = vector.broadcast %47 : vector<1x8xf32> to vector<8x8xf32>
    %49 = arith.addf %46, %48 : vector<8x8xf32>
    %c0_21 = arith.constant 0 : index
    %c8 = arith.constant 8 : index
    %50 = vector.load %arg6[%c0_21, %c8] : memref<16x16xf32, #tpu.memory_space<vmem>>, vector<8x8xf32>
    tpu.vector_store %arg6[%c0_21, %c8], %49 {strides = array<i32>} : memref<16x16xf32, #tpu.memory_space<vmem>>, vector<8x8xf32>,
    %51 = vector.extract_strided_slice %4 {offsets = [8, 0], sizes = [8, 16], strides = [1, 1]} : vector<16x16xf32> to vector<8x16xf32>
    %52 = vector.extract_strided_slice %32 {offsets = [1, 0, 0, 0], sizes = [1, 1, 8, 8], strides = [1, 1, 1, 1]} : vector<2x2x8x8xf32> to vector<1x1x8x8xf32>
    %53 = vector.shape_cast %52 : vector<1x1x8x8xf32> to vector<8x8xf32>
    %54 = vector.extract_strided_slice %51 {offsets = [0, 0], sizes = [8, 8], strides = [1, 1]} : vector<8x16xf32> to vector<8x8xf32>
    %cst_22 = arith.constant dense<0.000000e+00> : vector<8x8xf32>
    %55 = tpu.matmul %53, %54, %cst_22 {dimension_numbers = #tpu.dot_dimension_numbers<[1], [0], [0], [1], [0, 0, 1, 1], [], []>} : vector<8x8xf32>, vector<8x8xf32>, vector<8x8xf32> -> vector<8x8xf32>
    %56 = vector.extract_strided_slice %33 {offsets = [0, 0], sizes = [1, 8], strides = [1, 1]} : vector<1x16xf32> to vector<1x8xf32>
    %57 = vector.broadcast %56 : vector<1x8xf32> to vector<8x8xf32>
    %58 = arith.addf %55, %57 : vector<8x8xf32>
    %c8_23 = arith.constant 8 : index
    %c0_24 = arith.constant 0 : index
    %59 = vector.load %arg6[%c8_23, %c0_24] : memref<16x16xf32, #tpu.memory_space<vmem>>, vector<8x8xf32>
    tpu.vector_store %arg6[%c8_23, %c0_24], %58 {strides = array<i32>} : memref<16x16xf32, #tpu.memory_space<vmem>>, vector<8x8xf32>,
    %60 = vector.extract_strided_slice %32 {offsets = [1, 1, 0, 0], sizes = [1, 1, 8, 8], strides = [1, 1, 1, 1]} : vector<2x2x8x8xf32> to vector<1x1x8x8xf32>
    %61 = vector.shape_cast %60 : vector<1x1x8x8xf32> to vector<8x8xf32>
    %62 = vector.extract_strided_slice %51 {offsets = [0, 8], sizes = [8, 8], strides = [1, 1]} : vector<8x16xf32> to vector<8x8xf32>
    %cst_25 = arith.constant dense<0.000000e+00> : vector<8x8xf32>
    %63 = tpu.matmul %61, %62, %cst_25 {dimension_numbers = #tpu.dot_dimension_numbers<[1], [0], [0], [1], [0, 0, 1, 1], [], []>} : vector<8x8xf32>, vector<8x8xf32>, vector<8x8xf32> -> vector<8x8xf32>
    %64 = vector.extract_strided_slice %33 {offsets = [0, 8], sizes = [1, 8], strides = [1, 1]} : vector<1x16xf32> to vector<1x8xf32>
    %65 = vector.broadcast %64 : vector<1x8xf32> to vector<8x8xf32>
    %66 = arith.addf %63, %65 : vector<8x8xf32>
    %c8_26 = arith.constant 8 : index
    %c8_27 = arith.constant 8 : index
    %67 = vector.load %arg6[%c8_26, %c8_27] : memref<16x16xf32, #tpu.memory_space<vmem>>, vector<8x8xf32>
    tpu.vector_store %arg6[%c8_26, %c8_27], %66 {strides = array<i32>} : memref<16x16xf32, #tpu.memory_space<vmem>>, vector<8x8xf32>,
    return
  }
  func.func @transform_0(%arg0: i32) -> (i32, i32) {
    %c0_i32 = arith.constant 0 : i32
    %c0_i32_0 = arith.constant 0 : i32
    return %arg0, %c0_i32 : i32, i32
  }
  func.func @transform_1(%arg0: i32) -> (i32, i32) {
    %c0_i32 = arith.constant 0 : i32
    %c0_i32_0 = arith.constant 0 : i32
    %c0_i32_1 = arith.constant 0 : i32
    return %c0_i32, %c0_i32_0 : i32, i32
  }
  func.func @transform_2(%arg0: i32) -> (i32, i32) {
    %c0_i32 = arith.constant 0 : i32
    %c0_i32_0 = arith.constant 0 : i32
    %c0_i32_1 = arith.constant 0 : i32
    return %c0_i32, %c0_i32_0 : i32, i32
  }
  func.func @transform_3(%arg0: i32) -> (i32, i32, i32, i32) {
    %c0_i32 = arith.constant 0 : i32
    %c0_i32_0 = arith.constant 0 : i32
    %c0_i32_1 = arith.constant 0 : i32
    %c0_i32_2 = arith.constant 0 : i32
    return %arg0, %c0_i32, %c0_i32_0, %c0_i32_1 : i32, i32, i32, i32
  }
  func.func @transform_4(%arg0: i32) -> (i32, i32) {
    %c0_i32 = arith.constant 0 : i32
    %c0_i32_0 = arith.constant 0 : i32
    %c0_i32_1 = arith.constant 0 : i32
    return %c0_i32, %c0_i32_0 : i32, i32
  }
  func.func @transform_5(%arg0: i32) -> (i32, i32) {
    %c0_i32 = arith.constant 0 : i32
    %c0_i32_0 = arith.constant 0 : i32
    return %arg0, %c0_i32 : i32, i32
  }
}

</mosaic_0001>

<bundles_post_ra>
// kernel: tpu_custom_call.1
= control target key start
LH: loop header
LB: loop body
LE: loop exit
PB: predicated region body
PF: predicated region fallthrough
CT: control target
= control target key end

     0   :  { %10 = vsyncpa [#allocation3], 0  ;;  %s1569_s0 = inlined_call_operand.hbm [shape: f32[32,32], index: 0, kind: input, shape index: {}]   ;;  %s1570_s1 = inlined_call_operand.vmem [shape: f32[32,16], index: 1, kind: input, shape index: {}]   ;;  %s1571_s2 = inlined_call_operand.vmem [shape: f32[16,4], index: 2, kind: input, shape index: {}]   ;;  %s1572_s3 = inlined_call_operand.vmem [shape: f32[4,2,8,8], index: 3, kind: input, shape index: {}]   ;;  %s1573_s4 = inlined_call_operand.vmem [shape: f32[1,16], index: 4, kind: input, shape index: {}]   ;;  %s1574_s5 = inlined_call_operand.vmem [shape: f32[32,16], index: 5, kind: output, shape index: {}]  }
   0x1   :  { %12 = vsyncpa [#allocation3 + $0x1], 0  ;;  %s1394_s18 = smov 0   ;;  %s1396_s19 = smov 0  }
   0x2   :  { %s1398_s20 = smov 0   ;;  %s1400_s21 = smov 0  }
   0x3 LB: > { %s1145_s22 = sadd.s32 4294967295, %s1353_s21   ;;  %s1414_s23 = sadd.s32 1, %s1353_s21   ;;  %s1353_s21 = sphi %s1400_s21, %s1583_s21   ;;  %s1349_s20 = sphi %s1398_s20, %s1582_s20   ;;  %s1345_s19 = sphi %s1396_s19, %s1581_s19   ;;  %s1341_s18 = sphi %s1394_s18, %s1580_s18  }
   0x4   : > { %s22_s24 = ssub.s32 %s1353_s21, %s1414_s23  ;;  %s25_s25 = sadd.s32 1, %s1349_s20 }
   0x5   : > { %p23_p0 = scmp.eq.s32.totalorder %s22_s24, 0  ;;  %p32_p1 = scmp.ne.s32.totalorder %s1349_s20, %s1345_s19 }
   0x6   : > { %p33_p2 = scmp.eq.s32.totalorder %s1353_s21, 0  ;;  %p38_p3 = scmp.ne.s32.totalorder %s1345_s19, %s1341_s18 }
   0x7   : > { %s1424_s26 = scalar_select %p23_p0, %s1349_s20, %s25_s25  }
   0x8   : > { %p34_p4 = por %p33_p2, %p32_p1  ;;  %p39_p5 = scmp.eq.s32.totalorder %s1145_s22, 0 }
   0x9   : > { %p1234_p6 = scmp.lt.s32.totalorder %s1353_s21, 2  ;;  %s186_s28 = sand.u32 1, %s1349_s20  }
   0xa   : > { %p1429_p7 = por %p39_p5, %p38_p3  ;;  %s1149_s29 = sshll.u32 %s186_s28, 4 }
   0xb   : > { %s1170_s30 = sshll.u32 %s1353_s21, 8  ;;  %s190_s9 = scalar_lea.vmem [#allocation2], %s1149_s29 }
   0xc   : > { %s1576_s27 = scalar_select %p1429_p7, 1, 0 }
   0xd   : > { %s1438_s8 = scalar_lea.hbm %s1569_s0, %s1170_s30  ;;  %s197_s10 = sshll.u32 %s190_s9, 4  ;;  %s1440_s10 = int_to_ptr.vmem [resolvable:$true] %s197_s10 }
   0xe   : > { %p1442_p8 = pnand %p1234_p6, %p34_p4  ;;  %s1447_s12 = scalar_lea.sflag [#allocation3], %s186_s28 }
   0xf   : > { %s1291_s13 = scalar_lea.hbm %s1438_s8, 256  ;;  %s1296_s16 = scalar_lea.hbm %s1569_s0, 512 }
  0x10   : > { %p1292_p10 = scmp.ne.s32.totalorder %s1438_s8, %s1291_s13  ;;  %p1293_p11 = pneg %p1442_p8 }
  0x11   : > { %p1297_p0 = scmp.lt.s32.totalorder %s1438_s8, %s1569_s0  ;;  %p1298_p1 = scmp.lt.s32.totalorder %s1296_s16, %s1291_s13 }
  0x12   : > { %p1294_p12 = pnand %p1293_p11, %p1292_p10 }
  0x13   : > { %p1299_p2 = por %p1298_p1, %p1297_p0 }
  0x14   : > { %p1295_p13 = pneg %p1294_p12 }
  0x16   : > { %p1300_p3 = pnand %p1299_p2, %p1295_p13 }
  0x18   : > { %1303 = shalt.err (!%p1300_p3)
}
  0x19   : > { %s1304_s24 = scalar_lea.vmem %s1440_s10, 256  ;;  %s1355_s25 = smov [#allocation2]  }
  0x1a   : > { %p1305_p4 = scmp.ne.s32.totalorder %s1440_s10, %s1304_s24  ;;  %s1309_s28 = sshll.u32 %s1355_s25, 4  ;;  %s1310_s28 = int_to_ptr.vmem [resolvable:$false] %s1309_s28 }
  0x1b   : > { %s1311_s29 = scalar_lea.vmem %s1310_s28, 512  ;;  %p1312_p10 = scmp.lt.s32.totalorder %s1440_s10, %s1310_s28 }
  0x1c   : > { %p1307_p5 = pnand %p1305_p4, %p1293_p11  ;;  %p1313_p12 = scmp.lt.s32.totalorder %s1311_s29, %s1304_s24 }
  0x1e   : > { %p1308_p6 = pneg %p1307_p5  ;;  %p1314_p9 = por %p1313_p12, %p1312_p10 }
  0x20   : > { %p1315_p7 = pnand %p1314_p9, %p1308_p6 }
  0x22   : > { %1318 = shalt.err (!%p1315_p7)
}
  0x23   : > { %s1356_s30 = smov 128   ;;  %s1357_s6 = smov 8  }
  0x24   : > { %1233 = dma.hbm_to_vmem [thread:$0]  (!%p1442_p8), %s1438_s8, 256, %s1440_s10, %s1447_s12, %s1356_s30, %s1356_s30, %s1357_s6  }
  0x25   : > { %p215_p11 = scmp.lt.s32.totalorder %s1353_s21, 3  ;;  %p1578_p13 = scmp.ge.s32.totalorder %s1353_s21, 1 }
  0x27   : > { %p216_p0 = pnand %p1578_p13, %p215_p11 }
  0x28   : > { %s221_s7 = sand.u32 (!%p216_p0), 1, %s1345_s19   ;;  %p1579_p7 = scmp.ne.s32.totalorder (!%p216_p0), %s1576_s27, 0 }
  0x29   : > { %219 = sbr.rel (%p216_p0) target bundleno = 1505 (0x5e1), region = 40  ;;  %s1153_s9 = sshll.u32 (!%p216_p0), %s221_s7, 4 }
  0x2a   : > { %s222_s13 = scalar_lea.sflag (!%p216_p0), [#allocation3], %s221_s7  ;;  %s225_s14 = scalar_lea.vmem (!%p216_p0), [#allocation2], %s1153_s9 }
  0x2e   : > { %1336 = dma.done.wait (%p1579_p7), %s222_s13, 256  }
  0x2f   : > { %1338 = vsyncadd (%p1579_p7), %s222_s13, 4294967040  ;;  %v279_v0 = vld [vmem:[%s1570_s1 + $0x18] sm:$0xff]  ;;  %v278_v1 = vld [vmem:[%s1570_s1 + $0x10] sm:$0xff]  ;;  %vm280_vm0 = vcmask 261120   ;;  %v1358_v10 = vmov 0.0   ;;  %vm364_vm1 = vcmask 130048   ;;  %v582_v17 = vlaneseq }
  0x30   : > { %1190 = vmatprep.subr.mxu0 %v279_v0  ;;  %v272_v2 = vld [vmem:[%s225_s14] sm:$0xff]  ;;  %v277_v3 = vld [vmem:[%s1570_s1 + $0x8] sm:$0xff]  ;;  %s1359_s29 = smov 126   ;;  %v1360_v27 = vmov 1966171168   ;;  %s1154_s30 = sshll.u32 %s1145_s22, 1 }
  0x31   : > { %1191 = vmatpush3.msra.mxu0 %v279_v0  ;;  %v274_v4 = vmax.f32 %v272_v2, 0.0  ;;  %v273_v5 = vld [vmem:[%s225_s14 + $0x8] sm:$0xff]  ;;  %v276_v7 = vld [vmem:[%s1570_s1] sm:$0xff]  ;;  %v583_v18 = vshrl.u32 %v582_v17, 7  ;;  %v613_v28 = vunpack.c.l.s4 %v1360_v27  ;;  %p260_p8 = scmp.lt.s32.totalorder %s1154_s30, 3  ;;  %vm700_vm3 = vcmask 64512  }
  0x32   : > { %v363_v6 = vld [vmem:[%s1571_s2 + $0x8] sm:$0xff]  ;;  %1192 = vmatprep.subr.mxu0 %v278_v1  ;;  %v275_v8 = vmax.f32 %v273_v5, 0.0  ;;  %v362_v9 = vld [vmem:[%s1571_s2] sm:$0xff]  ;;  %s1361_s21 = smov 120   ;;  %vm1362_vm7 = vmmov 0   ;;  %s1363_s15 = smov 8  }
  0x33   : > { %1201 = vmatprep.subr.mxu1 %v363_v6  ;;  %1193 = vmatpush3.msra.mxu0 %v278_v1  ;;  %v591_v19 = vsub.s32 1, %v583_v18  ;;  %v584_v24 = vsub.s32 0, %v583_v18  ;;  %v614_v29 = vunpack.c.0.s8 %v613_v28  ;;  %s1585_s30 = smov (!%p260_p8, %s1154_s30), 3  ;;  %vm909_vm8 = vcmask 130112  }
  0x34   : > { %1198 = vmatprep.mubr.msk.f32.mxu0 %vm280_vm0, %v274_v4  ;;  %1194 = vmatprep.subr.mxu0 %v277_v3  ;;  %s1171_s6 = sshll.u32 %s1585_s30, 4  ;;  %s1158_s16 = sshll.u32 %s1585_s30, 3 }
  0x35   : > { %1202 = vmatpush3.msra.mxu1 %v363_v6  ;;  %1195 = vmatpush3.msra.mxu0 %v277_v3  ;;  %v617_v31 = vsub.s32 %v614_v29, %v583_v18  ;;  %s1514_s13 = scalar_lea.vmem %s1572_s3, %s1171_s6  ;;  %s270_s11 = scalar_lea.vmem %s1574_s5, %s1158_s16 }
  0x36   : > { %1196 = vmatprep.subr.mxu0 %v276_v7  ;;  %1203 = vmatprep.subr.mxu1 %v362_v9  ;;  %v681_v40 = vld [vmem:[%s1514_s13 + $0x8] sm:$0xff]  ;;  %v683_v48 = vld [vmem:[%s1514_s13 + $0x18] sm:$0xff]  ;;  %v682_v60 = vld [vmem:[%s1514_s13 + $0x10] sm:$0xff] }
  0x37   : > { %1197 = vmatpush3.msra.mxu0 %v276_v7  ;;  %1204 = vmatpush3.msra.mxu1 %v362_v9  ;;  %v680_v62 = vld [vmem:[%s1514_s13] sm:$0xff] }
  0x38   : > { %1199 = vmatmul.mubr.msk.f32.vlgmr.msra.gmra.mxu0 %vm280_vm0, %v275_v8  ;;  %1208 = vmatprep.subr.mxu1 %v1358_v10 }
  0x39   : > { %1213 = vmatprep.subr.mxu0 %v1358_v10  ;;  %1215 = vmatprep.mubr.msk.f32.mxu0 %vm1362_vm7, %v1358_v10 }
  0xf8   : > { %v1498_v11 = vpop.f32.mrf.mxu0 }
  0xfa   : > { %v1500_v12 = vpop.f32.mrf.mxu0 }
  0xfb   : > { %1205 = vmatprep.mubr.msk.f32.mxu1 %vm364_vm1, %v1500_v12 }
  0xfc   : > { %1206 = vmatmul.mubr.msk.f32.vlgmr.msra.gmra.mxu1 %vm364_vm1, %v1498_v11 }
  0xfd   : > { %1209 = vmatpush3.msra.mxu1 %v1500_v12  ;;  %1210 = vmatprep.mubr.msk.f32.mxu1 %vm1362_vm7, %v1358_v10 }
  0xfe   : > { %1218 = vmatprep.subr.mxu1 %v1358_v10 }
 0x1bc   : > { %v1207_v13 = vpop.f32.mrf.mxu1 }
 0x1be   : > { %v437_v14 = vpop.f32.mrf.mxu1 }
 0x1bf   : > { %512 = vrot.lane.b32.xlu0 %v437_v14, %s1359_s29 }
 0x1c3   : > { %514 = vrot.lane.b32.xlu0 %v1207_v13, %s1359_s29 }
 0x231   : > { %v513_v15 = vpop.permute.xlu0 %512 }
 0x235   : > { %v515_v16 = vpop.permute.xlu0 %514 }
 0x236   : > { %550 = vxpose.xlu1.b32.start.end [1/1] (short) (narrow) %v515_v16, 8 }
 0x23a   : > { %518 = vxpose.xlu1.b32.start.end [1/1] (short) (narrow) %v513_v15, 8 }
 0x2b2   : > { %v566_v20 = vpop.trf.xlu1 }
 0x2b3   : > { %v606_v21 = vrot.slane %v566_v20, %v591_v19  ;;  %v599_v25 = vrot.slane %v566_v20, %v584_v24 }
 0x2b5   : > { %608 = vbcast.lane.b32.xlu1 %v606_v21, 256 }
 0x2b6   : > { %v534_v22 = vpop.trf.xlu1 }
 0x2b7   : > { %v592_v23 = vrot.slane %v534_v22, %v591_v19  ;;  %v585_v26 = vrot.slane %v534_v22, %v584_v24 }
 0x2b9   : > { %594 = vbcast.lane.b32.xlu0 %v592_v23, 256 }
 0x2d7   : > { %446 = vxpose.xlu0.b32.start.end [1/1] (short) (narrow) %v437_v14, 8 }
 0x2de   : > { %478 = vxpose.xlu1.b32.start.end [1/1] (short) (narrow) %v1207_v13, 8 }
 0x2fc   : > { %601 = vbcast.lane.b32.xlu1 %v599_v25, 256 }
 0x300   : > { %587 = vbcast.lane.b32.xlu0 %v585_v26, 256 }
 0x327   : > { %v609_v34 = vpop.permute.xlu1 %608 }
 0x32b   : > { %v595_v30 = vpop.permute.xlu0 %594 }
 0x353   : > { %v462_v32 = vpop.trf.xlu0 }
 0x354   : > { %v618_v33 = vrot.slane %v462_v32, %v617_v31  ;;  %v1163_v32 = vld [vmem:[%s1573_s4] ss:$0 sm:$0xff] }
 0x356   : > { %v619_v35 = vcombine.high %v618_v33, %v618_v33  ;;  %v626_v56 = vrot.slane %v618_v33, %v617_v31 }
 0x358   : > { %v633_v36 = vrot.slane %v619_v35, %v617_v31  ;;  %v659_v61 = vrot.slane %v626_v56, %v584_v24 }
 0x35a   : > { %v663_v37 = vrot.slane %v633_v36, %v584_v24  ;;  %v494_v38 = vpop.trf.xlu1 }
 0x35b   : > { %v640_v39 = vrot.slane %v494_v38, %v617_v31 }
 0x35c   : > { %v677_v41 = vadd.f32 %v663_v37, %v595_v30 }
 0x35d   : > { %v641_v42 = vcombine.high %v640_v39, %v640_v39  ;;  %v648_v53 = vrot.slane %v640_v39, %v617_v31 }
 0x35e   : > { %v685_v43 = vadd.f32 %v681_v40, %v677_v41 }
 0x35f   : > { %v655_v44 = vrot.slane %v641_v42, %v617_v31  ;;  %v667_v57 = vrot.slane %v648_v53, %v584_v24 }
 0x360   : > { %vm689_vm2 = vcmp.gt.f32.partialorder %v685_v43, 0.0  ;;  %v693_v45 = vmul.f32 0.2, %v685_v43 }
 0x361   : > { %v671_v46 = vrot.slane %v655_v44, %v584_v24 }
 0x362   : > { %v697_v47 = vsel %vm689_vm2, %v685_v43, %v693_v45 }
 0x363   : > { %v704_v49 = vsel %vm700_vm3, %v697_v47, -inf  ;;  %v679_v50 = vadd.f32 %v671_v46, %v609_v34 }
 0x364   : > { %705 = vmax.xlane.f32.xlu0 %v704_v49 }
 0x365   : > { %v687_v51 = vadd.f32 %v683_v48, %v679_v50 }
 0x367   : > { %vm691_vm4 = vcmp.gt.f32.partialorder %v687_v51, 0.0  ;;  %v695_v52 = vmul.f32 0.2, %v687_v51 }
 0x369   : > { %v699_v54 = vsel %vm691_vm4, %v687_v51, %v695_v52 }
 0x36a   : > { %v710_v55 = vsel %vm700_vm3, %v699_v54, -inf }
 0x36b   : > { %711 = vmax.xlane.f32.xlu1 %v710_v55 }
 0x36e   : > { %v602_v58 = vpop.permute.xlu1 %601 }
 0x36f   : > { %v678_v59 = vadd.f32 %v667_v57, %v602_v58 }
 0x371   : > { %v686_v0 = vadd.f32 %v682_v60, %v678_v59 }
 0x372   : > { %v588_v63 = vpop.permute.xlu0 %587 }
 0x373   : > { %v676_v1 = vadd.f32 %v659_v61, %v588_v63  ;;  %v694_v4 = vmul.f32 0.2, %v686_v0  ;;  %vm690_vm6 = vcmp.gt.f32.partialorder %v686_v0, 0.0 }
 0x375   : > { %v684_v2 = vadd.f32 %v680_v62, %v676_v1  ;;  %v698_v7 = vsel %vm690_vm6, %v686_v0, %v694_v4 }
 0x376   : > { %v707_v8 = vsel %vm700_vm3, %v698_v7, -inf }
 0x377   : > { %vm688_vm5 = vcmp.gt.f32.partialorder %v684_v2, 0.0  ;;  %v692_v3 = vmul.f32 0.2, %v684_v2 }
 0x379   : > { %v696_v5 = vsel %vm688_vm5, %v684_v2, %v692_v3 }
 0x37a   : > { %v701_v6 = vsel %vm700_vm3, %v696_v5, -inf }
 0x37b   : > { %702 = vmax.xlane.f32.xlu0 %v701_v6 }
 0x37c   : > { %985 = vrot.lane.b32.xlu1 %v1498_v11, %s1361_s21 }
 0x37f   : > { %708 = vmax.xlane.f32.xlu0 %v707_v8 }
 0x3ed   : > { %v706_v9 = vpop.xlane.xlu0 %705 }
 0x3ee   : > { %v714_v13 = vsub.f32 %v697_v47, %v706_v9 }
 0x3f0   : > { %v719_v16 = vmul.f32 1.442695, %v714_v13 }
 0x3f4   : > { %v712_v14 = vpop.xlane.xlu1 %711 }
 0x3f5   : > { %v716_v15 = vsub.f32 %v699_v54, %v712_v14 }
 0x3f7   : > { %v723_v17 = vmul.f32 1.442695, %v716_v15 }
 0x3f8   : > { %v986_v38 = vpop.permute.xlu1 %985 }
 0x3f9   : > { %1275 = vpow2.f32 %v723_v17 }
 0x3fa   : > { %1277 = vpow2.f32 %v719_v16 }
 0x404   : > { %v703_v18 = vpop.xlane.xlu0 %702 }
 0x405   : > { %v713_v28 = vsub.f32 %v696_v5, %v703_v18 }
 0x406   : > { %v1276_v19 = vpop.eup %1275 }
 0x407   : > { %v734_v20 = vsel %vm700_vm3, %v1276_v19, 0.0  ;;  %v1278_v21 = vpop.eup %1277  ;;  %v717_v29 = vmul.f32 1.442695, %v713_v28 }
 0x408   : > { %v709_v22 = vpop.xlane.xlu0 %708  ;;  %735 = vadd.xlane.f32.xlu0 %v734_v20  ;;  %v728_v25 = vsel %vm700_vm3, %v1278_v21, 0.0 }
 0x409   : > { %v715_v23 = vsub.f32 %v698_v7, %v709_v22 }
 0x40b   : > { %v721_v24 = vmul.f32 1.442695, %v715_v23 }
 0x40c   : > { %729 = vadd.xlane.f32.xlu0 %v728_v25 }
 0x40d   : > { %1279 = vpow2.f32 %v721_v24 }
 0x40e   : > { %1281 = vpow2.f32 %v717_v29 }
 0x41a   : > { %v1280_v26 = vpop.eup %1279 }
 0x41b   : > { %v731_v27 = vsel %vm700_vm3, %v1280_v26, 0.0  ;;  %v1282_v30 = vpop.eup %1281 }
 0x41c   : > { %732 = vadd.xlane.f32.xlu1 %v731_v27  ;;  %v725_v31 = vsel %vm700_vm3, %v1282_v30, 0.0 }
 0x422   : > { %826 = vrot.lane.b32.xlu0 %v1500_v12, %s1361_s21 }
 0x441   : > { %726 = vadd.xlane.f32.xlu0 %v725_v31 }
 0x457   : > { %829 = vrot.lane.b32.xlu0 %v1163_v32, %s1361_s21 }
 0x491   : > { %v736_v33 = vpop.xlane.xlu0 %735 }
 0x495   : > { %v730_v34 = vpop.xlane.xlu0 %729 }
 0x496   : > { %1283 = vrcp.f32 %v730_v34 }
 0x497   : > { %1285 = vrcp.f32 %v736_v33 }
 0x499   : > { %v827_v35 = vpop.permute.xlu0 %826 }
 0x49a   : > { %1214 = vmatpush3.msra.mxu0 %v827_v35 }
 0x49b   : > { %1223 = vmatprep.subr.mxu0 %v1358_v10 }
 0x4a3   : > { %v1284_v12 = vpop.eup %1283 }
 0x4a4   : > { %v740_v36 = vmul.f32 %v1284_v12, %v1278_v21  ;;  %v1286_v37 = vpop.eup %1285 }
 0x4a5   : > { %v744_v39 = vmul.f32 %v1286_v37, %v1276_v19  ;;  %v733_v40 = vpop.xlane.xlu1 %732 }
 0x4a6   : > { %1216 = vmatmul.mubr.msk.f32.vlgmr.msra.gmra.mxu0 %vm700_vm3, %v740_v36 }
 0x4a7   : > { %1224 = vmatpush3.msra.mxu0 %v986_v38  ;;  %1225 = vmatprep.mubr.msk.f32.mxu0 %vm1362_vm7, %v1358_v10 }
 0x4aa   : > { %1226 = vmatmul.mubr.msk.f32.vlgmr.msra.gmra.mxu0 %vm700_vm3, %v744_v39 }
 0x4ca   : > { %v727_v41 = vpop.xlane.xlu0 %726 }
 0x4cb   : > { %1287 = vrcp.f32 %v727_v41 }
 0x4cc   : > { %1289 = vrcp.f32 %v733_v40 }
 0x4ce   : > { %v830_v46 = vpop.permute.xlu0 %829 }
 0x4d8   : > { %v1288_v42 = vpop.eup %1287 }
 0x4d9   : > { %v738_v43 = vmul.f32 %v1288_v42, %v1282_v30  ;;  %v1290_v44 = vpop.eup %1289 }
 0x4da   : > { %v742_v45 = vmul.f32 %v1290_v44, %v1280_v26 }
 0x4db   : > { %1211 = vmatmul.mubr.msk.f32.vlgmr.msra.gmra.mxu1 %vm700_vm3, %v738_v43 }
 0x4dc   : > { %1219 = vmatpush3.msra.mxu1 %v1498_v11  ;;  %1220 = vmatprep.mubr.msk.f32.mxu1 %vm1362_vm7, %v1358_v10 }
 0x4df   : > { %1221 = vmatmul.mubr.msk.f32.vlgmr.msra.gmra.mxu1 %vm700_vm3, %v742_v45 }
 0x566   : > { %v901_v47 = vpop.f32.mrf.mxu0 }
 0x567   : > { %v902_v48 = vadd.f32 %v901_v47, %v830_v46 }
 0x568   : > { %v1217_v49 = vpop.f32.mrf.mxu0 }
 0x569   : > { %906 = vrot.lane.b32.xlu1 %v902_v48, %s1363_s15 }
 0x56a   : > { %v1057_v50 = vpop.f32.mrf.mxu0 }
 0x56b   : > { %v1058_v51 = vadd.f32 %v1057_v50, %v830_v46 }
 0x56c   : > { %v1227_v52 = vpop.f32.mrf.mxu0 }
 0x56d   : > { %1062 = vrot.lane.b32.xlu0 %v1058_v51, %s1363_s15 }
 0x59b   : > { %v821_v11 = vpop.f32.mrf.mxu1 }
 0x59c   : > { %v822_v10 = vadd.f32 %v1163_v32, %v821_v11 }
 0x59d   : > { %v1212_v53 = vpop.f32.mrf.mxu1 }
 0x59e   : > { %825 = vst.msk [vmem:[%s270_s11] sm:$0xff] %vm700_vm3, %v822_v10 }
 0x59f   : > { %v980_v54 = vpop.f32.mrf.mxu1 }
 0x5a0   : > { %v981_v56 = vadd.f32 %v1163_v32, %v980_v54 }
 0x5a1   : > { %v1222_v55 = vpop.f32.mrf.mxu1 }
 0x5a2   : > { %984 = vst.msk [vmem:[%s270_s11 + $0x8] sm:$0xff] %vm700_vm3, %v981_v56 }
 0x5db   : > { %v907_v57 = vpop.permute.xlu1 %906 }
 0x5dc   : > { %910 = vst.msk [vmem:[%s270_s11] sm:$0xff] %vm909_vm8, %v907_v57 }
 0x5df   : > { %v1063_v58 = vpop.permute.xlu0 %1062 }
 0x5e0   : > { %1065 = vst.msk [vmem:[%s270_s11 + $0x8] sm:$0xff] %vm909_vm8, %v1063_v58 }
 0x5e1 PF: > { %p15_p9 = scmp.ge.s32.totalorder %s1414_s23, 4   ;;  %s1580_s18 = smov %s1345_s19 }
 0x5e2   : > { %s1581_s19 = smov %s1349_s20  ;;  %s1582_s20 = smov %s1424_s26 }
 0x5e3   : > { %s1583_s21 = smov %s1414_s23  ;;  %17 = sbr.rel (!%p15_p9) target bundleno = 3 (0x3), region = 83 }
 0x5e8   :  { %1088 = vsyncpa [#allocation3], 1 }
 0x5e9   :  { %1090 = vsyncpa [#allocation3 + $0x1], 1 }

</bundles_post_ra>
